<compile_context>
chip_gen: v7x
topology: tpu7x:2x2x1
jax: 0.10.0
libtpu: 0.0.40
codegen_flags: <defaults>
</compile_context>

<pallas_src>
import jax
import jax.numpy as jnp
from jax.experimental import pallas as pl
from jax.experimental.pallas import tpu as pltpu


def _round_up(x, m):
    return ((x + m - 1) // m) * m


# ----------------------------- Pallas kernel --------------------------------
def mlp_head_kernel(x_ref, w1_ref, b1_ref, w2_ref, b2_ref, o_ref):
    # x_ref : (TM, D)     embeddings tile (bf16 or f32; cast in-register)
    # w1_ref: (D,  H)     bf16 first linear weight (resident)
    # b1_ref: (1,  H)     f32 bias (resident)
    # w2_ref: (H,  OP)    bf16 second linear weight, lane-padded (resident)
    # b2_ref: (1,  OP)    f32 bias, lane-padded (resident)
    # o_ref : (TM, OP)    bf16 output tile
    x = x_ref[...].astype(jnp.bfloat16)            # no-op when input is bf16
    h = jnp.dot(x, w1_ref[...], preferred_element_type=jnp.float32)
    h = jnp.maximum(h + b1_ref[...], 0.0)          # Linear + ReLU
    # TODO(synk): Dropout uses eval-mode semantics (identity); training-mode
    # stochastic dropout (pltpu.prng_seed/prng_random_bits) is not implemented.
    y = jnp.dot(h.astype(jnp.bfloat16), w2_ref[...],
                preferred_element_type=jnp.float32)
    o_ref[...] = (y + b2_ref[...]).astype(o_ref.dtype)


_TILE_CANDIDATES = (2048, 1536, 1024, 768, 512, 384, 256)


def _pick_tile_m(M, tile_m_max):
    """Pick an M tile: big (amortize ~0.35us/step), low padding waste,
    and >= 2 grid steps when possible so both v7x TensorCores get work."""
    if M <= 256:
        return M            # single block == full array dim (always legal)
    cands = [c for c in _TILE_CANDIDATES if c <= tile_m_max] or [256]
    viable = [c for c in cands if pl.cdiv(M, c) >= 2] or cands
    for c in viable:        # largest tile with <= ~5% last-block waste
        if pl.cdiv(M, c) * c <= 1.05 * M:
            return c
    return min(viable, key=lambda c: pl.cdiv(M, c) * c)


def mlp_head(embeddings, w1, b1, w2, b2, *, tile_m=2048,
             kernel_out_dtype=jnp.bfloat16):
    """Apply the MLP classification head with a fused Pallas kernel.

    embeddings: (B, L, D) bf16 or f32
    returns:    (B, L, O) float32 logits
    """
    B, L, D = embeddings.shape
    H = w1.shape[1]
    O = w2.shape[1]
    M = B * L

    x_bytes = embeddings.dtype.itemsize
    if x_bytes >= 4:
        # f32 x tiles are 2x the VMEM of bf16; halve the tile cap so the
        # double-buffered tiles stay comfortably inside the 32 MiB budget
        # (and v7x's 64 MiB physical VMEM).
        tile_m = min(tile_m, 1024)
    tm = _pick_tile_m(M, tile_m)
    grid = (pl.cdiv(M, tm),)

    # Lane-dense output: pad the class dim to 128 so stores are unmasked vst.
    O_pad = _round_up(O, 128)

    # x: reshape only — no dtype cast and no pad pass in the wrapper.  The
    # kernel casts to bf16 in-register and Pallas masks the ragged last block.
    x2d = embeddings.reshape(M, D)

    # Weights/biases are tiny and resident; a one-time cast/pad here is cheap.
    w1_bf = w1.astype(jnp.bfloat16)
    w2_bf = jnp.pad(w2, ((0, 0), (0, O_pad - O))).astype(jnp.bfloat16)
    b1_2d = b1.reshape(1, H).astype(jnp.float32)
    b2_2d = jnp.pad(b2.reshape(1, O), ((0, 0), (0, O_pad - O))).astype(
        jnp.float32)

    out_bytes = jnp.dtype(kernel_out_dtype).itemsize
    flops = 2 * M * (D * H + H * O_pad)
    bytes_accessed = (M * D * x_bytes + D * H * 2 + H * O_pad * 2
                      + H * 4 + O_pad * 4 + M * O_pad * out_bytes)

    out2d = pl.pallas_call(
        mlp_head_kernel,
        out_shape=jax.ShapeDtypeStruct((M, O_pad), kernel_out_dtype),
        grid_spec=pltpu.PrefetchScalarGridSpec(
            num_scalar_prefetch=0,
            grid=grid,
            in_specs=[
                pl.BlockSpec((tm, D), lambda i: (i, 0)),     # x (streamed)
                # Resident operands (constant index_map); Mosaic revisits the
                # same buffer for constant block indices, so no explicit
                # Buffered(1) is needed at these weight sizes.
                pl.BlockSpec((D, H), lambda i: (0, 0)),      # W1
                pl.BlockSpec((1, H), lambda i: (0, 0)),      # b1
                pl.BlockSpec((H, O_pad), lambda i: (0, 0)),  # W2
                pl.BlockSpec((1, O_pad), lambda i: (0, 0)),  # b2
            ],
            out_specs=pl.BlockSpec((tm, O_pad), lambda i: (i, 0)),
        ),
        compiler_params=pltpu.CompilerParams(
            dimension_semantics=("parallel",),
            vmem_limit_bytes=32 * 1024 * 1024),
        cost_estimate=pl.CostEstimate(
            flops=flops, transcendentals=0, bytes_accessed=bytes_accessed),
    )(x2d, w1_bf, b1_2d, w2_bf, b2_2d)

    # Slice away the lane padding; the f32 cast fuses into the small slice.
    return out2d[:, :O].astype(jnp.float32).reshape(B, L, O)


# ------------------------- synthetic ESM embedding ---------------------------
def synthetic_esm_embeddings(token_ids, embed_table):
    """Stand-in for `esm.logits(x, LogitsConfig(return_embeddings=True)).embeddings`.

    token_ids:   (B, L) int32
    embed_table: (V, D)
    returns:     (B, L, D) in the table's dtype (bf16 here, so the MLP-head
                 kernel streams 2 B/elem with no wrapper cast pass).
    """
    # Plain JAX glue; the real ESM backbone is not reproduced here.
    return jnp.take(embed_table, token_ids, axis=0)


# ---------------------------- full module forward ----------------------------
def esmc_with_mlp_forward(token_ids, params):
    emb = synthetic_esm_embeddings(token_ids, params["embed_table"])
    logits = mlp_head(emb, params["w1"], params["b1"],
                      params["w2"], params["b2"])
    return logits


# --------------------------------- main --------------------------------------
if __name__ == "__main__":
    # Small shapes consistent with the module's forward pass.
    B, L = 2, 8            # batch, sequence length
    V = 33                 # vocab size (ESM-C alphabet size, arbitrary here)
    D = 32                 # embedding_dim (1152 in the real model)
    H = 64                 # hidden_dims=[H]  (512 in the real model)
    O = 20                 # number of output classes (fixed by the module)

    key = jax.random.PRNGKey(0)
    k_emb, k_w1, k_b1, k_w2, k_b2, k_tok = jax.random.split(key, 6)

    params = {
        # The synthetic backbone emits bf16 embeddings ("best case" from the
        # review): the kernel reads bf16 x with no extra HBM pass.
        "embed_table": (jax.random.normal(k_emb, (V, D), jnp.float32)
                        * 0.1).astype(jnp.bfloat16),
        "w1": jax.random.normal(k_w1, (D, H), jnp.float32) * (1.0 / D ** 0.5),
        "b1": jax.random.normal(k_b1, (H,), jnp.float32) * 0.01,
        "w2": jax.random.normal(k_w2, (H, O), jnp.float32) * (1.0 / H ** 0.5),
        "b2": jax.random.normal(k_b2, (O,), jnp.float32) * 0.01,
    }

    token_ids = jax.random.randint(k_tok, (B, L), 0, V, dtype=jnp.int32)

    logits = jax.jit(esmc_with_mlp_forward)(token_ids, params)
    logits = jax.block_until_ready(logits)

    # Reference check against plain JAX MLP in f32 (same eval-mode semantics).
    # bf16 operands/output in the kernel -> loosened tolerance.
    emb = synthetic_esm_embeddings(
        token_ids, params["embed_table"]).astype(jnp.float32)
    ref = (jnp.maximum(emb @ params["w1"] + params["b1"], 0.0)
           @ params["w2"] + params["b2"])
    assert logits.shape == (B, L, O)
    assert jnp.allclose(logits, ref, atol=3e-2, rtol=3e-2)

    print("KERNEL_OK")
</pallas_src>

<mosaic_0001>
module attributes {stable_mosaic.version = 11 : i64} {
  func.func @mlp_head_kernel(%arg0: i32, %arg1: memref<16x32xbf16, #tpu.memory_space<vmem>>, %arg2: memref<32x64xbf16, #tpu.memory_space<vmem>>, %arg3: memref<1x64xf32, #tpu.memory_space<vmem>>, %arg4: memref<64x128xbf16, #tpu.memory_space<vmem>>, %arg5: memref<1x128xf32, #tpu.memory_space<vmem>>, %arg6: memref<16x128xbf16, #tpu.memory_space<vmem>>) attributes {dimension_semantics = [#tpu.dimension_semantics<parallel>], iteration_bounds = array<i64: 1>, scalar_prefetch = 0 : i64, scratch_operands = 0 : i64, tpu.core_type = #tpu.core_type<tc>, window_params = [{transform_indices = @transform_0, window_bounds = array<i64: 16, 32>}, {pipeline_mode = #tpu.pipeline_mode<synchronous>, transform_indices = @transform_1, window_bounds = array<i64: 32, 64>}, {pipeline_mode = #tpu.pipeline_mode<synchronous>, transform_indices = @transform_2, window_bounds = array<i64: 1, 64>}, {pipeline_mode = #tpu.pipeline_mode<synchronous>, transform_indices = @transform_3, window_bounds = array<i64: 64, 128>}, {pipeline_mode = #tpu.pipeline_mode<synchronous>, transform_indices = @transform_4, window_bounds = array<i64: 1, 128>}, {transform_indices = @transform_5, window_bounds = array<i64: 16, 128>}]} {
    %c0 = arith.constant 0 : index
    %c0_0 = arith.constant 0 : index
    %0 = vector.load %arg1[%c0, %c0_0] : memref<16x32xbf16, #tpu.memory_space<vmem>>, vector<16x32xbf16>
    %c0_1 = arith.constant 0 : index
    %c0_2 = arith.constant 0 : index
    %1 = vector.load %arg2[%c0_1, %c0_2] : memref<32x64xbf16, #tpu.memory_space<vmem>>, vector<32x64xbf16>
    %cst = arith.constant dense<0.000000e+00> : vector<16x64xf32>
    %2 = tpu.matmul %0, %1, %cst {dimension_numbers = #tpu.dot_dimension_numbers<[1], [0], [0], [1], [0, 0, 1, 1], [], []>} : vector<16x32xbf16>, vector<32x64xbf16>, vector<16x64xf32> -> vector<16x64xf32>
    %c0_3 = arith.constant 0 : index
    %c0_4 = arith.constant 0 : index
    %3 = vector.load %arg3[%c0_3, %c0_4] : memref<1x64xf32, #tpu.memory_space<vmem>>, vector<1x64xf32>
    %4 = vector.broadcast %3 : vector<1x64xf32> to vector<16x64xf32>
    %5 = arith.addf %2, %4 : vector<16x64xf32>
    %cst_5 = arith.constant 0.000000e+00 : f32
    %6 = vector.broadcast %cst_5 : f32 to vector<16x64xf32>
    %7 = arith.maximumf %5, %6 : vector<16x64xf32>
    %8 = arith.truncf %7 : vector<16x64xf32> to vector<16x64xbf16>
    %c0_6 = arith.constant 0 : index
    %c0_7 = arith.constant 0 : index
    %9 = vector.load %arg4[%c0_6, %c0_7] : memref<64x128xbf16, #tpu.memory_space<vmem>>, vector<64x128xbf16>
    %cst_8 = arith.constant dense<0.000000e+00> : vector<16x128xf32>
    %10 = tpu.matmul %8, %9, %cst_8 {dimension_numbers = #tpu.dot_dimension_numbers<[1], [0], [0], [1], [0, 0, 1, 1], [], []>} : vector<16x64xbf16>, vector<64x128xbf16>, vector<16x128xf32> -> vector<16x128xf32>
    %c0_9 = arith.constant 0 : index
    %c0_10 = arith.constant 0 : index
    %11 = vector.load %arg5[%c0_9, %c0_10] : memref<1x128xf32, #tpu.memory_space<vmem>>, vector<1x128xf32>
    %12 = vector.broadcast %11 : vector<1x128xf32> to vector<16x128xf32>
    %13 = arith.addf %10, %12 : vector<16x128xf32>
    %14 = arith.truncf %13 : vector<16x128xf32> to vector<16x128xbf16>
    %c0_11 = arith.constant 0 : index
    %c0_12 = arith.constant 0 : index
    %15 = vector.load %arg6[%c0_11, %c0_12] : memref<16x128xbf16, #tpu.memory_space<vmem>>, vector<16x128xbf16>
    tpu.vector_store %arg6[%c0_11, %c0_12], %14 {strides = array<i32>} : memref<16x128xbf16, #tpu.memory_space<vmem>>, vector<16x128xbf16>,
    return
  }
  func.func @transform_0(%arg0: i32) -> (i32, i32) {
    %c0_i32 = arith.constant 0 : i32
    %c0_i32_0 = arith.constant 0 : i32
    return %arg0, %c0_i32 : i32, i32
  }
  func.func @transform_1(%arg0: i32) -> (i32, i32) {
    %c0_i32 = arith.constant 0 : i32
    %c0_i32_0 = arith.constant 0 : i32
    %c0_i32_1 = arith.constant 0 : i32
    return %c0_i32, %c0_i32_0 : i32, i32
  }
  func.func @transform_2(%arg0: i32) -> (i32, i32) {
    %c0_i32 = arith.constant 0 : i32
    %c0_i32_0 = arith.constant 0 : i32
    %c0_i32_1 = arith.constant 0 : i32
    return %c0_i32, %c0_i32_0 : i32, i32
  }
  func.func @transform_3(%arg0: i32) -> (i32, i32) {
    %c0_i32 = arith.constant 0 : i32
    %c0_i32_0 = arith.constant 0 : i32
    %c0_i32_1 = arith.constant 0 : i32
    return %c0_i32, %c0_i32_0 : i32, i32
  }
  func.func @transform_4(%arg0: i32) -> (i32, i32) {
    %c0_i32 = arith.constant 0 : i32
    %c0_i32_0 = arith.constant 0 : i32
    %c0_i32_1 = arith.constant 0 : i32
    return %c0_i32, %c0_i32_0 : i32, i32
  }
  func.func @transform_5(%arg0: i32) -> (i32, i32) {
    %c0_i32 = arith.constant 0 : i32
    %c0_i32_0 = arith.constant 0 : i32
    return %arg0, %c0_i32 : i32, i32
  }
}

</mosaic_0001>

<bundles_post_ra>
// kernel: esmc_with_mlp_forward.1
= control target key start
LH: loop header
LB: loop body
LE: loop exit
PB: predicated region body
PF: predicated region fallthrough
CT: control target
= control target key end

     0   :  { %v254_v0 = vmov 0.0   ;;  %vm255_vm0 = vmmov 0   ;;  %vm51_vm1 = vcmask 261120   ;;  %vm138_vm2 = vcmask 523264   ;;  %s316_s1 = inlined_call_operand.vmem [shape: bf16[32,64], index: 1, kind: input, shape index: {}]   ;;  %s317_s3 = inlined_call_operand.vmem [shape: bf16[64,128], index: 3, kind: input, shape index: {}]   ;;  %s318_s0 = inlined_call_operand.vmem [shape: bf16[16,32], index: 0, kind: input, shape index: {}]   ;;  %s319_s2 = inlined_call_operand.vmem [shape: f32[1,64], index: 2, kind: input, shape index: {}]   ;;  %s320_s4 = inlined_call_operand.vmem [shape: f32[1,128], index: 4, kind: input, shape index: {}]   ;;  %s321_s5 = inlined_call_operand.vmem [shape: bf16[16,128], index: 5, kind: output, shape index: {}]  }
   0x1   :  { %225 = vmatprep.subr.bf16.mxu0 %v254_v0  ;;  %v247_v1 = vld [vmem:[%s316_s1] sm:$0xff]   ;;  %229 = vmatprep.mubr.msk.bf16.mxu0 %vm255_vm0, %v254_v0  ;;  %v248_v2 = vld [vmem:[%s316_s1 + $0x8] sm:$0xff]   ;;  %v252_v6 = vld [vmem:[%s317_s3 + $0x10] sm:$0xff]  }
   0x2   :  { %233 = vmatprep.subr.bf16.mxu1 %v254_v0  ;;  %241 = vmatprep.mubr.msk.bf16.mxu1 %vm255_vm0, %v254_v0  ;;  %v250_v3 = vld [vmem:[%s317_s3] sm:$0xff]   ;;  %v251_v5 = vld [vmem:[%s317_s3 + $0x8] sm:$0xff]   ;;  %v253_v7 = vld [vmem:[%s317_s3 + $0x18] sm:$0xff]  }
   0x3   :  { %226 = vmatpush3.bf16.msra.mxu0 %v247_v1  ;;  %v249_v4 = vld [vmem:[%s318_s0] sm:$0xff]   ;;  %234 = vmatpush3.bf16.msra.mxu1 %v250_v3 }
   0x4   :  { %227 = vmatprep.subr.bf16.mxu0 %v254_v0  ;;  %235 = vmatprep.subr.bf16.mxu1 %v254_v0  ;;  %v197_v8 = vld [vmem:[%s319_s2] ss:$0 sm:$0xff] }
   0x5   :  { %v202_v18 = vld [vmem:[%s320_s4] ss:$0 sm:$0xff] }
   0x7   :  { %228 = vmatpush3.bf16.msra.mxu0 %v248_v2  ;;  %236 = vmatpush3.bf16.msra.mxu1 %v251_v5 }
   0x8   :  { %237 = vmatprep.subr.bf16.mxu1 %v254_v0 }
   0xa   :  { %230 = vmatmul.mubr.msk.bf16.vlgmr.msra.gmra.mrb[0].mxu0 %vm51_vm1, %v249_v4 }
   0xb   :  { %238 = vmatpush3.bf16.msra.mxu1 %v252_v6 }
   0xc   :  { %239 = vmatprep.subr.bf16.mxu1 %v254_v0 }
   0xf   :  { %240 = vmatpush3.bf16.msra.mxu1 %v253_v7 }
  0xdd   :  { %v89_v9 = vpop.f32.mrb[0].mxu0 }
  0xde   :  { %v90_v10 = vadd.f32 %v197_v8, %v89_v9  ;;  %v231_v11 = vpop.f32.mrb[1].mxu0 }
  0xdf   :  { %v92_v12 = vpop.f32.mrb[2].mxu0 }
  0xe0   :  { %v93_v13 = vadd.f32 %v197_v8, %v92_v12  ;;  %v232_v14 = vpop.f32.mrb[3].mxu0  ;;  %v96_v15 = vmax.f32 %v90_v10, 0.0 }
  0xe2   :  { %v97_v16 = vmax.f32 %v93_v13, 0.0 }
  0xe4   :  { %v98_v17 = vpack.c.bf16 %v97_v16, %v96_v15 }
  0xe6   :  { %242 = vmatmul.mubr.msk.bf16.vlgmr.msra.gmra.mrb[0].mxu1 %vm138_vm2, %v98_v17 }
 0x1b9   :  { %v176_v19 = vpop.f32.mrb[0].mxu1 }
 0x1ba   :  { %v243_v20 = vpop.f32.mrb[1].mxu1  ;;  %v177_v22 = vadd.f32 %v202_v18, %v176_v19 }
 0x1bb   :  { %v179_v21 = vpop.f32.mrb[2].mxu1 }
 0x1bc   :  { %v180_v23 = vadd.f32 %v202_v18, %v179_v21  ;;  %v244_v24 = vpop.f32.mrb[3].mxu1 }
 0x1be   :  { %v215_v25 = vpack.c.bf16 %v180_v23, %v177_v22 }
 0x1c0   :  { %216 = vst [vmem:[%s321_s5] sm:$0xff] %v215_v25  }

</bundles_post_ra>
